<compile_context>
chip_gen: v5e
topology: v5e:2x2
jax: 0.10.0
libtpu: 0.0.40
codegen_flags: <defaults>
</compile_context>

<pallas_src>
import functools

import jax
import jax.numpy as jnp
from jax import lax
from jax.experimental import pallas as pl
from jax.experimental.pallas import tpu as pltpu


def _inverted_residual0_kernel(x_ref, wdw_ref, b1_ref, wpw_ref, b2_ref, out_ref,
                               *, H, W, C_in):
    """Fused DWConv3x3 + BN1 + ReLU + Conv1x1 + BN2 on lane-packed activations.

    x_ref   : (R, W*C_in)        R = Nb*H rows of lane-packed NHWC pixels (f32)
    wdw_ref : (9, W*C_in)        depthwise taps, BN1 scale + column border masks folded
    b1_ref  : (1, W*C_in)        folded BN1 bias, lane-tiled
    wpw_ref : (W*C_in, W*C_out)  block-diagonal pointwise weight (bf16), BN2 scale folded
    b2_ref  : (1, W*C_out)       folded BN2 bias, lane-tiled
    out_ref : (R, W*C_out)
    """
    x = x_ref[...].astype(jnp.float32)                 # (R, WCi)
    R, WCi = x.shape

    # Row-within-image coordinate, (R, 1) only (no full-slab int32 intermediates).
    h = lax.broadcasted_iota(jnp.int32, (R, 1), 0) % H

    wdw = wdw_ref[...]                                  # (9, WCi) f32, hoisted load
    lane_shift = {-1: C_in, 1: WCi - C_in}              # cyclic-equivalent lane rolls

    acc = jnp.zeros_like(x)
    for kh in range(3):
        dh = kh - 1
        # Row-shifted slab via sublane roll; wrapped rows zeroed => conv zero padding
        # (also across image boundaries when Nb > 1).  Only one shifted slab is live
        # at a time.
        if dh == -1:
            row = jnp.where(h >= 1, pltpu.roll(x, shift=1, axis=0), 0.0)
        elif dh == 0:
            row = x
        else:
            row = jnp.where(h <= H - 2, pltpu.roll(x, shift=R - 1, axis=0), 0.0)
        for kw in range(3):
            dw = kw - 1
            # Column borders are handled by zeros folded into wdw, so the cyclic
            # lane roll needs no mask here.
            tap = row if dw == 0 else pltpu.roll(row, shift=lane_shift[dw], axis=1)
            k = kh * 3 + kw
            acc = acc + tap * wdw[k:k + 1, :]

    # BN1 bias (scale already folded into wdw) + ReLU, in f32 on the VPU.
    y = jnp.maximum(acc + b1_ref[...], 0.0)

    # Pointwise 1x1 conv: one bf16 MXU matmul against the block-diagonal packed weight,
    # f32 accumulation; output stays lane-packed (R, W*C_out) -> full-lane store.
    z = jnp.dot(y.astype(jnp.bfloat16), wpw_ref[...],
                preferred_element_type=jnp.float32)
    z = z + b2_ref[...]

    out_ref[...] = z.astype(out_ref.dtype)


def _is_tpu_v7x():
    try:
        kind = jax.devices()[0].device_kind.lower()
    except Exception:
        return False
    return "7" in kind


def _estimate_vmem_bytes(nb, H, W, C_in, C_out, in_itemsize, out_itemsize):
    """Per-grid-step VMEM: double-buffered I/O + (double-buffered) resident weights
    + live slab-sized kernel temporaries."""
    R = nb * H
    WCi, WCo = W * C_in, W * C_out
    f32 = 4
    io = 2 * R * WCi * in_itemsize + 2 * R * WCo * out_itemsize
    weights = 2 * (9 * WCi * f32 + WCi * f32 + WCi * WCo * 2 + WCo * f32)  # wpw is bf16
    temps = 5 * R * WCi * f32 + 2 * R * WCo * f32   # x, row, tap, acc, y + z, out-cast
    return io + weights + temps


def _choose_batch_block(N, H, W, C_in, C_out, in_itemsize, out_itemsize,
                        vmem_budget, prefer_even_steps, target_rows=512):
    """Pick Nb (batch images per grid step) so that the (Nb*H, W*C) slab:
       * keeps the row dim sublane-aligned (or full extent),
       * fits the per-generation VMEM budget (I/O + weights + temporaries),
       * is large enough (>= target_rows rows) to amortize the ~600-cycle/step
         overhead when possible,
       * on v7x prefers an even number of grid steps so both TensorCores get
         equal work."""
    candidates = [nb for nb in range(1, N + 1)
                  if N % nb == 0 and (nb == N or (nb * H) % 8 == 0)]
    fitting = [nb for nb in candidates
               if _estimate_vmem_bytes(nb, H, W, C_in, C_out,
                                       in_itemsize, out_itemsize) <= vmem_budget]
    if not fitting:
        return min(candidates)  # smallest legal block; rely on vmem_limit headroom

    big_enough = [nb for nb in fitting if nb * H >= target_rows]
    if big_enough:
        if prefer_even_steps:
            even = [nb for nb in big_enough if (N // nb) % 2 == 0]
            if even:
                return min(even)
        return min(big_enough)

    # Everything is small: take the biggest fitting block; on v7x keep both cores
    # busy if that costs at most a 2x smaller block.
    best = max(fitting)
    if prefer_even_steps:
        even = [nb for nb in fitting if (N // nb) % 2 == 0]
        if even and 2 * max(even) >= best:
            best = max(even)
    return best


def inverted_residual0(x_nchw, w_dw, w_pw,
                       gamma1, beta1, mean1, var1,
                       gamma2, beta2, mean2, var2,
                       eps=1e-5):
    """x_nchw: (N, C_in, H, W) float32.  Returns (N, C_out, H, W)."""
    N, C_in, H, W = x_nchw.shape
    C_out = w_pw.shape[0]
    WCi, WCo = W * C_in, W * C_out

    # ---- fold BatchNorm (inference semantics) into conv weights + a single bias ----
    s1 = gamma1 / jnp.sqrt(var1 + eps)
    b1 = beta1 - mean1 * s1
    s2 = gamma2 / jnp.sqrt(var2 + eps)
    b2 = beta2 - mean2 * s2

    # depthwise: torch (C_in,1,3,3) -> (3,3,C_in), fold BN1 scale, lane-tile W times,
    # then fold the zero-padding column-border masks into the weights:
    #   kw=0 reads x(.., w-1) -> invalid at output column w=0     -> zero those lanes
    #   kw=2 reads x(.., w+1) -> invalid at output column w=W-1   -> zero those lanes
    wdw = jnp.transpose(w_dw[:, 0, :, :], (1, 2, 0)) * s1            # (3,3,C_in)
    wdw_packed = jnp.tile(wdw.reshape(9, C_in), (1, W))               # (9, W*C_in)
    w_idx = jnp.arange(WCi) // C_in                                   # pixel column / lane
    kw_idx = jnp.arange(9) % 3
    border = (((kw_idx[:, None] == 0) & (w_idx[None, :] == 0)) |
              ((kw_idx[:, None] == 2) & (w_idx[None, :] == W - 1)))
    wdw_packed = jnp.where(border, 0.0, wdw_packed).astype(jnp.float32)
    b1_packed = jnp.tile(b1, W).reshape(1, WCi).astype(jnp.float32)

    # pointwise: torch (C_out,C_in,1,1) -> (C_in,C_out), fold BN2 scale, expand to a
    # block-diagonal (W*C_in, W*C_out) weight (bf16 for the MXU) so the 1x1 conv is a
    # single lane-packed matmul with no in-kernel reshape.
    wpw = jnp.transpose(w_pw[:, :, 0, 0], (1, 0)) * s2[None, :]       # (C_in, C_out)
    wpw_bd = jnp.kron(jnp.eye(W, dtype=wpw.dtype), wpw).astype(jnp.bfloat16)
    b2_packed = jnp.tile(b2, W).reshape(1, WCo).astype(jnp.float32)

    # ---- lane-pack the activation: NCHW -> NHWC -> (N*H, W*C_in); NO jnp.pad ----
    x_packed = jnp.transpose(x_nchw, (0, 2, 3, 1)).reshape(N * H, WCi)

    is_v7x = _is_tpu_v7x()
    # v7x: 64 MiB physical VMEM per TC -> cap at 48 MiB; v5e/v6e: 128 MiB -> 64 MiB.
    vmem_limit = (48 << 20) if is_v7x else (64 << 20)
    Nb = _choose_batch_block(N, H, W, C_in, C_out,
                             in_itemsize=x_nchw.dtype.itemsize,
                             out_itemsize=x_nchw.dtype.itemsize,
                             vmem_budget=int(vmem_limit * 0.75),
                             prefer_even_steps=is_v7x)
    R = Nb * H

    kernel = functools.partial(_inverted_residual0_kernel, H=H, W=W, C_in=C_in)

    out_packed = pl.pallas_call(
        kernel,
        out_shape=jax.ShapeDtypeStruct((N * H, WCo), x_nchw.dtype),
        grid_spec=pltpu.PrefetchScalarGridSpec(
            num_scalar_prefetch=0,
            grid=(N // Nb,),
            in_specs=[
                pl.BlockSpec((R, WCi), lambda i: (i, 0)),
                pl.BlockSpec((9, WCi), lambda i: (0, 0)),
                pl.BlockSpec((1, WCi), lambda i: (0, 0)),
                pl.BlockSpec((WCi, WCo), lambda i: (0, 0)),
                pl.BlockSpec((1, WCo), lambda i: (0, 0)),
            ],
            out_specs=pl.BlockSpec((R, WCo), lambda i: (i, 0)),
        ),
        compiler_params=pltpu.CompilerParams(
            dimension_semantics=("parallel",),
            vmem_limit_bytes=vmem_limit,
        ),
    )(x_packed, wdw_packed, b1_packed, wpw_bd, b2_packed)

    # (N*H, W*C_out) -> NCHW (wrapper-side layout glue only).
    return jnp.transpose(out_packed.reshape(N, H, W, C_out), (0, 3, 1, 2))


def _reference(x_nchw, w_dw, w_pw, gamma1, beta1, mean1, var1,
               gamma2, beta2, mean2, var2, eps=1e-5):
    """Pure-JAX reference (lax conv) for validation."""
    C_in = x_nchw.shape[1]
    y = lax.conv_general_dilated(
        x_nchw, w_dw, window_strides=(1, 1), padding=((1, 1), (1, 1)),
        dimension_numbers=("NCHW", "OIHW", "NCHW"),
        feature_group_count=C_in)
    s1 = gamma1 / jnp.sqrt(var1 + eps)
    b1 = beta1 - mean1 * s1
    y = jnp.maximum(y * s1[None, :, None, None] + b1[None, :, None, None], 0.0)
    z = lax.conv_general_dilated(
        y, w_pw, window_strides=(1, 1), padding=((0, 0), (0, 0)),
        dimension_numbers=("NCHW", "OIHW", "NCHW"))
    s2 = gamma2 / jnp.sqrt(var2 + eps)
    b2 = beta2 - mean2 * s2
    return z * s2[None, :, None, None] + b2[None, :, None, None]


if __name__ == "__main__":
    N, C_in, C_out, H, W = 2, 8, 16, 16, 16   # W*C_in = 128 lanes, W*C_out = 256 lanes

    key = jax.random.PRNGKey(0)
    k_x, k_dw, k_pw = jax.random.split(key, 3)

    x = jax.random.normal(k_x, (N, C_in, H, W), dtype=jnp.float32)
    # PyTorch param shapes: dw (C_in, 1, 3, 3), pw (C_out, C_in, 1, 1)
    w_dw = jax.random.normal(k_dw, (C_in, 1, 3, 3), dtype=jnp.float32) * 0.1
    w_pw = jax.random.normal(k_pw, (C_out, C_in, 1, 1), dtype=jnp.float32) * 0.1

    # Deterministic BatchNorm params (inference mode / running stats).
    gamma1 = 1.0 + 0.01 * jnp.arange(C_in, dtype=jnp.float32)
    beta1 = 0.02 * jnp.arange(C_in, dtype=jnp.float32)
    mean1 = 0.05 * jnp.arange(C_in, dtype=jnp.float32)
    var1 = 1.0 + 0.03 * jnp.arange(C_in, dtype=jnp.float32)

    gamma2 = 1.0 + 0.01 * jnp.arange(C_out, dtype=jnp.float32)
    beta2 = 0.02 * jnp.arange(C_out, dtype=jnp.float32)
    mean2 = 0.05 * jnp.arange(C_out, dtype=jnp.float32)
    var2 = 1.0 + 0.03 * jnp.arange(C_out, dtype=jnp.float32)

    out = inverted_residual0(x, w_dw, w_pw, gamma1, beta1, mean1, var1,
                             gamma2, beta2, mean2, var2)
    out = jax.block_until_ready(out)

    ref = _reference(x, w_dw, w_pw, gamma1, beta1, mean1, var1,
                     gamma2, beta2, mean2, var2)
    assert out.shape == (N, C_out, H, W)
    # Tolerance accounts for the bf16 MXU pointwise matmul (f32 accumulation).
    assert jnp.allclose(out, ref, atol=2e-2, rtol=2e-2), "mismatch vs reference"

    print("KERNEL_OK")
</pallas_src>

<mosaic_0001>
module attributes {stable_mosaic.version = 11 : i64} {
  func.func @_inverted_residual0_kernel(%arg0: i32, %arg1: memref<32x128xf32, #tpu.memory_space<vmem>>, %arg2: memref<9x128xf32, #tpu.memory_space<vmem>>, %arg3: memref<1x128xf32, #tpu.memory_space<vmem>>, %arg4: memref<128x256xbf16, #tpu.memory_space<vmem>>, %arg5: memref<1x256xf32, #tpu.memory_space<vmem>>, %arg6: memref<32x256xf32, #tpu.memory_space<vmem>>) attributes {dimension_semantics = [#tpu.dimension_semantics<parallel>], iteration_bounds = array<i64: 1>, scalar_prefetch = 0 : i64, scratch_operands = 0 : i64, tpu.core_type = #tpu.core_type<tc>, window_params = [{transform_indices = @transform_0, window_bounds = array<i64: 32, 128>}, {pipeline_mode = #tpu.pipeline_mode<synchronous>, transform_indices = @transform_1, window_bounds = array<i64: 9, 128>}, {pipeline_mode = #tpu.pipeline_mode<synchronous>, transform_indices = @transform_2, window_bounds = array<i64: 1, 128>}, {pipeline_mode = #tpu.pipeline_mode<synchronous>, transform_indices = @transform_3, window_bounds = array<i64: 128, 256>}, {pipeline_mode = #tpu.pipeline_mode<synchronous>, transform_indices = @transform_4, window_bounds = array<i64: 1, 256>}, {transform_indices = @transform_5, window_bounds = array<i64: 32, 256>}]} {
    %c0 = arith.constant 0 : index
    %c0_0 = arith.constant 0 : index
    %0 = vector.load %arg1[%c0, %c0_0] : memref<32x128xf32, #tpu.memory_space<vmem>>, vector<32x128xf32>
    %1 = tpu.iota {dimensions = array<i32: 0>} : vector<32x1xi32>
    %c16_i32 = arith.constant 16 : i32
    %c0_i32 = arith.constant 0 : i32
    %2 = arith.cmpi eq, %c16_i32, %c0_i32 : i32
    %c1_i32 = arith.constant 1 : i32
    %3 = arith.select %2, %c1_i32, %c16_i32 : i32
    %4 = vector.broadcast %3 : i32 to vector<32x1xi32>
    %5 = arith.remsi %1, %4 : vector<32x1xi32>
    %c0_i32_1 = arith.constant 0 : i32
    %6 = vector.broadcast %c0_i32_1 : i32 to vector<32x1xi32>
    %7 = arith.cmpi ne, %5, %6 : vector<32x1xi32>
    %c0_i32_2 = arith.constant 0 : i32
    %8 = vector.broadcast %c0_i32_2 : i32 to vector<32x1xi32>
    %9 = arith.cmpi slt, %5, %8 : vector<32x1xi32>
    %c0_i32_3 = arith.constant 0 : i32
    %10 = arith.cmpi slt, %3, %c0_i32_3 : i32
    %11 = vector.broadcast %10 : i1 to vector<32x1xi1>
    %12 = vector.broadcast %11 : vector<32x1xi1> to vector<32x1xi1>
    %13 = arith.xori %9, %12 : vector<32x1xi1>
    %14 = arith.andi %13, %7 : vector<32x1xi1>
    %15 = vector.broadcast %3 : i32 to vector<32x1xi32>
    %16 = arith.addi %5, %15 : vector<32x1xi32>
    %17 = arith.select %14, %16, %5 : vector<32x1xi1>, vector<32x1xi32>
    %c0_4 = arith.constant 0 : index
    %c0_5 = arith.constant 0 : index
    %18 = vector.load %arg2[%c0_4, %c0_5] : memref<9x128xf32, #tpu.memory_space<vmem>>, vector<9x128xf32>
    %cst = arith.constant 0.000000e+00 : f32
    %19 = vector.broadcast %cst : f32 to vector<32x128xf32>
    %c1_i32_6 = arith.constant 1 : i32
    %20 = vector.broadcast %c1_i32_6 : i32 to vector<32x1xi32>
    %21 = arith.cmpi sge, %17, %20 : vector<32x1xi32>
    %c1_i32_7 = arith.constant 1 : i32
    %22 = tpu.dynamic_rotate %0 by %c1_i32_7 dim 0 : vector<32x128xf32>, i32 -> vector<32x128xf32>
    %cst_8 = arith.constant 0.000000e+00 : f32
    %23 = vector.shape_cast %21 : vector<32x1xi1> to vector<32x1xi1>
    %24 = vector.broadcast %23 : vector<32x1xi1> to vector<32x128xi1>
    %25 = vector.broadcast %cst_8 : f32 to vector<32x128xf32>
    %26 = arith.select %24, %22, %25 : vector<32x128xi1>, vector<32x128xf32>
    %c8_i32 = arith.constant 8 : i32
    %27 = tpu.dynamic_rotate %26 by %c8_i32 dim 1 : vector<32x128xf32>, i32 -> vector<32x128xf32>
    %28 = vector.extract_strided_slice %18 {offsets = [0, 0], sizes = [1, 128], strides = [1, 1]} : vector<9x128xf32> to vector<1x128xf32>
    %29 = vector.broadcast %28 : vector<1x128xf32> to vector<32x128xf32>
    %30 = arith.mulf %27, %29 : vector<32x128xf32>
    %31 = arith.addf %19, %30 : vector<32x128xf32>
    %32 = vector.extract_strided_slice %18 {offsets = [1, 0], sizes = [1, 128], strides = [1, 1]} : vector<9x128xf32> to vector<1x128xf32>
    %33 = vector.broadcast %32 : vector<1x128xf32> to vector<32x128xf32>
    %34 = arith.mulf %26, %33 : vector<32x128xf32>
    %35 = arith.addf %31, %34 : vector<32x128xf32>
    %c120_i32 = arith.constant 120 : i32
    %36 = tpu.dynamic_rotate %26 by %c120_i32 dim 1 : vector<32x128xf32>, i32 -> vector<32x128xf32>
    %37 = vector.extract_strided_slice %18 {offsets = [2, 0], sizes = [1, 128], strides = [1, 1]} : vector<9x128xf32> to vector<1x128xf32>
    %38 = vector.broadcast %37 : vector<1x128xf32> to vector<32x128xf32>
    %39 = arith.mulf %36, %38 : vector<32x128xf32>
    %40 = arith.addf %35, %39 : vector<32x128xf32>
    %c8_i32_9 = arith.constant 8 : i32
    %41 = tpu.dynamic_rotate %0 by %c8_i32_9 dim 1 : vector<32x128xf32>, i32 -> vector<32x128xf32>
    %42 = vector.extract_strided_slice %18 {offsets = [3, 0], sizes = [1, 128], strides = [1, 1]} : vector<9x128xf32> to vector<1x128xf32>
    %43 = vector.broadcast %42 : vector<1x128xf32> to vector<32x128xf32>
    %44 = arith.mulf %41, %43 : vector<32x128xf32>
    %45 = arith.addf %40, %44 : vector<32x128xf32>
    %46 = vector.extract_strided_slice %18 {offsets = [4, 0], sizes = [1, 128], strides = [1, 1]} : vector<9x128xf32> to vector<1x128xf32>
    %47 = vector.broadcast %46 : vector<1x128xf32> to vector<32x128xf32>
    %48 = arith.mulf %0, %47 : vector<32x128xf32>
    %49 = arith.addf %45, %48 : vector<32x128xf32>
    %c120_i32_10 = arith.constant 120 : i32
    %50 = tpu.dynamic_rotate %0 by %c120_i32_10 dim 1 : vector<32x128xf32>, i32 -> vector<32x128xf32>
    %51 = vector.extract_strided_slice %18 {offsets = [5, 0], sizes = [1, 128], strides = [1, 1]} : vector<9x128xf32> to vector<1x128xf32>
    %52 = vector.broadcast %51 : vector<1x128xf32> to vector<32x128xf32>
    %53 = arith.mulf %50, %52 : vector<32x128xf32>
    %54 = arith.addf %49, %53 : vector<32x128xf32>
    %c14_i32 = arith.constant 14 : i32
    %55 = vector.broadcast %c14_i32 : i32 to vector<32x1xi32>
    %56 = arith.cmpi sle, %17, %55 : vector<32x1xi32>
    %c31_i32 = arith.constant 31 : i32
    %57 = tpu.dynamic_rotate %0 by %c31_i32 dim 0 : vector<32x128xf32>, i32 -> vector<32x128xf32>
    %cst_11 = arith.constant 0.000000e+00 : f32
    %58 = vector.shape_cast %56 : vector<32x1xi1> to vector<32x1xi1>
    %59 = vector.broadcast %58 : vector<32x1xi1> to vector<32x128xi1>
    %60 = vector.broadcast %cst_11 : f32 to vector<32x128xf32>
    %61 = arith.select %59, %57, %60 : vector<32x128xi1>, vector<32x128xf32>
    %c8_i32_12 = arith.constant 8 : i32
    %62 = tpu.dynamic_rotate %61 by %c8_i32_12 dim 1 : vector<32x128xf32>, i32 -> vector<32x128xf32>
    %63 = vector.extract_strided_slice %18 {offsets = [6, 0], sizes = [1, 128], strides = [1, 1]} : vector<9x128xf32> to vector<1x128xf32>
    %64 = vector.broadcast %63 : vector<1x128xf32> to vector<32x128xf32>
    %65 = arith.mulf %62, %64 : vector<32x128xf32>
    %66 = arith.addf %54, %65 : vector<32x128xf32>
    %67 = vector.extract_strided_slice %18 {offsets = [7, 0], sizes = [1, 128], strides = [1, 1]} : vector<9x128xf32> to vector<1x128xf32>
    %68 = vector.broadcast %67 : vector<1x128xf32> to vector<32x128xf32>
    %69 = arith.mulf %61, %68 : vector<32x128xf32>
    %70 = arith.addf %66, %69 : vector<32x128xf32>
    %c120_i32_13 = arith.constant 120 : i32
    %71 = tpu.dynamic_rotate %61 by %c120_i32_13 dim 1 : vector<32x128xf32>, i32 -> vector<32x128xf32>
    %72 = vector.extract_strided_slice %18 {offsets = [8, 0], sizes = [1, 128], strides = [1, 1]} : vector<9x128xf32> to vector<1x128xf32>
    %73 = vector.broadcast %72 : vector<1x128xf32> to vector<32x128xf32>
    %74 = arith.mulf %71, %73 : vector<32x128xf32>
    %75 = arith.addf %70, %74 : vector<32x128xf32>
    %c0_14 = arith.constant 0 : index
    %c0_15 = arith.constant 0 : index
    %76 = vector.load %arg3[%c0_14, %c0_15] : memref<1x128xf32, #tpu.memory_space<vmem>>, vector<1x128xf32>
    %77 = vector.broadcast %76 : vector<1x128xf32> to vector<32x128xf32>
    %78 = arith.addf %75, %77 : vector<32x128xf32>
    %cst_16 = arith.constant 0.000000e+00 : f32
    %79 = vector.broadcast %cst_16 : f32 to vector<32x128xf32>
    %80 = arith.maximumf %78, %79 : vector<32x128xf32>
    %81 = arith.truncf %80 : vector<32x128xf32> to vector<32x128xbf16>
    %c0_17 = arith.constant 0 : index
    %c0_18 = arith.constant 0 : index
    %82 = vector.load %arg4[%c0_17, %c0_18] : memref<128x256xbf16, #tpu.memory_space<vmem>>, vector<128x256xbf16>
    %cst_19 = arith.constant dense<0.000000e+00> : vector<32x256xf32>
    %83 = tpu.matmul %81, %82, %cst_19 {dimension_numbers = #tpu.dot_dimension_numbers<[1], [0], [0], [1], [0, 0, 1, 1], [], []>} : vector<32x128xbf16>, vector<128x256xbf16>, vector<32x256xf32> -> vector<32x256xf32>
    %c0_20 = arith.constant 0 : index
    %c0_21 = arith.constant 0 : index
    %84 = vector.load %arg5[%c0_20, %c0_21] : memref<1x256xf32, #tpu.memory_space<vmem>>, vector<1x256xf32>
    %85 = vector.broadcast %84 : vector<1x256xf32> to vector<32x256xf32>
    %86 = arith.addf %83, %85 : vector<32x256xf32>
    %c0_22 = arith.constant 0 : index
    %c0_23 = arith.constant 0 : index
    %87 = vector.load %arg6[%c0_22, %c0_23] : memref<32x256xf32, #tpu.memory_space<vmem>>, vector<32x256xf32>
    tpu.vector_store %arg6[%c0_22, %c0_23], %86 {strides = array<i32>} : memref<32x256xf32, #tpu.memory_space<vmem>>, vector<32x256xf32>,
    return
  }
  func.func @transform_0(%arg0: i32) -> (i32, i32) {
    %c0_i32 = arith.constant 0 : i32
    %c0_i32_0 = arith.constant 0 : i32
    return %arg0, %c0_i32 : i32, i32
  }
  func.func @transform_1(%arg0: i32) -> (i32, i32) {
    %c0_i32 = arith.constant 0 : i32
    %c0_i32_0 = arith.constant 0 : i32
    %c0_i32_1 = arith.constant 0 : i32
    return %c0_i32, %c0_i32_0 : i32, i32
  }
  func.func @transform_2(%arg0: i32) -> (i32, i32) {
    %c0_i32 = arith.constant 0 : i32
    %c0_i32_0 = arith.constant 0 : i32
    %c0_i32_1 = arith.constant 0 : i32
    return %c0_i32, %c0_i32_0 : i32, i32
  }
  func.func @transform_3(%arg0: i32) -> (i32, i32) {
    %c0_i32 = arith.constant 0 : i32
    %c0_i32_0 = arith.constant 0 : i32
    %c0_i32_1 = arith.constant 0 : i32
    return %c0_i32, %c0_i32_0 : i32, i32
  }
  func.func @transform_4(%arg0: i32) -> (i32, i32) {
    %c0_i32 = arith.constant 0 : i32
    %c0_i32_0 = arith.constant 0 : i32
    %c0_i32_1 = arith.constant 0 : i32
    return %c0_i32, %c0_i32_0 : i32, i32
  }
  func.func @transform_5(%arg0: i32) -> (i32, i32) {
    %c0_i32 = arith.constant 0 : i32
    %c0_i32_0 = arith.constant 0 : i32
    return %arg0, %c0_i32 : i32, i32
  }
}

</mosaic_0001>

<bundles_post_ra>
// kernel: tpu_custom_call.1
= control target key start
LH: loop header
LB: loop body
LE: loop exit
PB: predicated region body
PF: predicated region fallthrough
CT: control target
= control target key end

     0   :  { %10 = vsyncpa [#allocation3], 0  ;;  %s936_s0 = inlined_call_operand.hbm [shape: f32[32,128], index: 0, kind: input, shape index: {}]   ;;  %s937_s1 = inlined_call_operand.hbm [shape: f32[9,128], index: 1, kind: input, shape index: {}]   ;;  %s938_s2 = inlined_call_operand.vmem [shape: f32[1,128], index: 2, kind: input, shape index: {}]   ;;  %s939_s3 = inlined_call_operand.hbm [shape: bf16[128,256], index: 3, kind: input, shape index: {}]   ;;  %s940_s4 = inlined_call_operand.vmem [shape: f32[1,256], index: 4, kind: input, shape index: {}]   ;;  %s941_s5 = inlined_call_operand.hbm [shape: f32[32,256], index: 5, kind: output, shape index: {}]  }
   0x1   :  { %11 = vsyncpa [#allocation6], 0 }
   0x2   :  { %12 = vsyncpa [#allocation4], 0  ;;  %s30_s20 = sshll.u32 %s937_s1, 4  ;;  %s697_s21 = smov [#allocation5]   ;;  %s31_s20 = int_to_ptr.hbm [resolvable:$true] %s30_s20 }
   0x3   :  { %s32_s22 = sshll.u32 %s697_s21, 4  ;;  %s17_s25 = sshll.u32 %s936_s0, 4  ;;  %s33_s22 = int_to_ptr.vmem [resolvable:$true] %s32_s22  ;;  %s18_s25 = int_to_ptr.hbm [resolvable:$true] %s17_s25 }
   0x4   :  { %s698_s26 = smov 128   ;;  %s699_s27 = smov 8  }
   0x5   :  { %38 = dma.hbm_to_vmem [thread:$0]  %s31_s20, 256, %s33_s22, [#allocation6], %s698_s26, %s698_s26, %s699_s27  }
   0x6   :  { %s700_s28 = smov [#allocation2]   ;;  %s45_s7 = sshll.u32 %s939_s3, 4  ;;  %s46_s7 = int_to_ptr.hbm [resolvable:$true] %s45_s7 }
   0x7   :  { %s19_s29 = sshll.u32 %s700_s28, 4  ;;  %s701_s1 = smov [#allocation7]   ;;  %s20_s29 = int_to_ptr.vmem [resolvable:$true] %s19_s29 }
   0x8   :  { %25 = dma.hbm_to_vmem [thread:$0]  %s18_s25, 512, %s20_s29, [#allocation3], %s698_s26, %s698_s26, %s699_s27  }
   0x9   :  { %s47_s8 = sshll.u32 %s701_s1, 4  ;;  %s48_s8 = int_to_ptr.vmem [resolvable:$true] %s47_s8 }
   0xa   :  { %53 = dma.hbm_to_vmem [thread:$0]  %s46_s7, 2048, %s48_s8, [#allocation6], %s698_s26, %s698_s26, %s699_s27  }
   0xb   :  { %691 = dma.done.wait [#allocation3], 512  }
   0xc   :  { %692 = vsyncadd [#allocation3], 4294966784 }
   0xd   :  { %693 = dma.done.wait [#allocation6], 2304  }
   0xe   :  { %694 = vsyncadd [#allocation6], 4294964992  ;;  %v72_v0 = vlaneseq  ;;  %v748_v3 = vld [vmem:[#allocation2 + $0x10] sm:$0xff]  ;;  %v750_v4 = vld [vmem:[#allocation2 + $0x18] sm:$0xff]  ;;  %s702_s0 = smov 120   ;;  %s474_s14 = sshll.u32 %s941_s5, 4  ;;  %s475_s14 = int_to_ptr.hbm [resolvable:$true] %s474_s14 }
   0xf   :  { %v133_v5 = vrot.slane %v748_v3, 7  ;;  %v134_v6 = vrot.slane %v750_v4, 7  ;;  %199 = vrot.lane.b32.xlu2 %v748_v3, %s699_s27  ;;  %v756_v7 = vld [vmem:[#allocation2 + $0x8] sm:$0xff]  ;;  %v767_v12 = vld [vmem:[#allocation2] sm:$0xff]  ;;  %v244_v19 = vrot.slane %v748_v3, 1  ;;  %v245_v21 = vrot.slane %v750_v4, 1 }
  0x10   :  { %v73_v1 = vshrl.u32 %v72_v0, 7  ;;  %v132_v9 = vrot.slane %v756_v7, 7  ;;  %v131_v15 = vrot.slane %v767_v12, 7  ;;  %v242_v24 = vrot.slane %v767_v12, 1  ;;  %v546_v35 = vld [vmem:[#allocation7 + $0x70] sm:$0xf] }
  0x11   :  { %v243_v27 = vrot.slane %v756_v7, 1  ;;  %v567_v36 = vld [vmem:[#allocation7 + $0x74] sm:$0xf0]  ;;  %v566_v38 = vld [vmem:[#allocation7 + $0x74] sm:$0xf]  ;;  %s704_s15 = smov 256  }
  0x12   :  { %v75_v2 = vadd.s32 16, %v73_v1  ;;  %vm135_vm0 = vcmp.lt.s32.totalorder %v73_v1, 1  ;;  %v81_v14 = vand.u32 15, %v73_v1  ;;  %v76_v20 = vadd.s32 24, %v73_v1  ;;  %v548_v39 = vld [vmem:[#allocation7 + $0x78] sm:$0xf0] }
  0x13   :  { %v760_v10 = vsel %vm135_vm0, %v133_v5, %v134_v6  ;;  %v137_v11 = vsel %vm135_vm0, %v132_v9, %v133_v5  ;;  %v139_v16 = vsel %vm135_vm0, %v134_v6, %v131_v15  ;;  %v782_v18 = vsel %vm135_vm0, %v131_v15, %v132_v9  ;;  %v538_v41 = vld [vmem:[#allocation7 + $0x60] sm:$0xf]  ;;  %v565_v42 = vld [vmem:[#allocation7 + $0x64] sm:$0xf0]  ;;  %v564_v43 = vld [vmem:[#allocation7 + $0x64] sm:$0xf] }
  0x14   :  { %v95_v8 = vand.u32 15, %v75_v2  ;;  %184 = vrot.lane.b32.xlu1 %v760_v10, %s702_s0  ;;  %158 = vrot.lane.b32.xlu0 %v760_v10, %s699_s27  ;;  %vm127_vm2 = vcmp.ge.s32.totalorder %v81_v14, 1  ;;  %vm246_vm3 = vcmp.lt.s32.totalorder %v73_v1, 7  ;;  %v102_v23 = vand.u32 15, %v76_v20  ;;  %v540_v45 = vld [vmem:[#allocation7 + $0x68] sm:$0xf0] }
  0x15   :  { %v779_v17 = vsel %vm127_vm2, %v139_v16, 0.0  ;;  %v799_v22 = vsel %vm246_vm3, %v244_v19, %v245_v21  ;;  %v250_v25 = vsel %vm246_vm3, %v245_v21, %v242_v24  ;;  %v74_v28 = vadd.s32 8, %v73_v1  ;;  %v530_v50 = vld [vmem:[#allocation7 + $0x50] sm:$0xf]  ;;  %v563_v51 = vld [vmem:[#allocation7 + $0x54] sm:$0xf0] }
  0x16   :  { %vm129_vm1 = vcmp.ge.s32.totalorder %v95_v8, 1  ;;  %vm241_vm4 = vcmp.le.s32.totalorder %v102_v23, 14  ;;  %v819_v29 = vsel %vm246_vm3, %v242_v24, %v243_v27  ;;  %v248_v31 = vsel %vm246_vm3, %v243_v27, %v244_v19  ;;  %v562_v52 = vld [vmem:[#allocation7 + $0x54] sm:$0xf]  ;;  %v532_v54 = vld [vmem:[#allocation7 + $0x58] sm:$0xf0] }
  0x17   :  { %v769_v13 = vsel %vm129_vm1, %v137_v11, 0.0  ;;  %201 = vrot.lane.b32.xlu2 %v750_v4, %s699_s27  ;;  %v809_v26 = vsel %vm241_vm4, %v250_v25, 0.0  ;;  %v88_v30 = vand.u32 15, %v74_v28  ;;  %v547_v37 = vor.u32 %v567_v36, %v546_v35  ;;  %v846_v56 = vld [vmem:[#allocation5] sm:$0xff]  ;;  %v522_v57 = vld [vmem:[#allocation7 + $0x40] sm:$0xf] }
  0x18   :  { %v551_v40 = vor.u32 %v566_v38, %v548_v39  ;;  %v539_v44 = vor.u32 %v565_v42, %v538_v41  ;;  %v543_v47 = vor.u32 %v564_v43, %v540_v45  ;;  %v531_v53 = vor.u32 %v563_v51, %v530_v50  ;;  %v561_v58 = vld [vmem:[#allocation7 + $0x44] sm:$0xf0]  ;;  %v560_v59 = vld [vmem:[#allocation7 + $0x44] sm:$0xf]  ;;  %v524_v61 = vld [vmem:[#allocation7 + $0x48] sm:$0xf0] }
  0x19   :  { %vm239_vm5 = vcmp.le.s32.totalorder %v88_v30, 14  ;;  %568 = vmatpush.bf16.msra.mxu2 %v547_v37  ;;  %422 = vmatpush.bf16.msra.mxu0 %v547_v37  ;;  %v535_v55 = vor.u32 %v562_v52, %v532_v54  ;;  %v523_v60 = vor.u32 %v561_v58, %v522_v57  ;;  %v849_v62 = vperm.slane %v846_v56, 1  ;;  %v514_v8 = vld [vmem:[#allocation7 + $0x30] sm:$0xf]  ;;  %v559_v9 = vld [vmem:[#allocation7 + $0x34] sm:$0xf0] }
  0x1a   :  { %v828_v32 = vsel %vm239_vm5, %v248_v31, 0.0  ;;  %576 = vmatpush.bf16.msra.mxu3 %v551_v40  ;;  %441 = vmatpush.bf16.msra.mxu1 %v551_v40  ;;  %v852_v63 = vperm.slane %v846_v56, 0  ;;  %v527_v0 = vor.u32 %v560_v59, %v524_v61  ;;  %v558_v11 = vld [vmem:[#allocation7 + $0x34] sm:$0xf]  ;;  %v515_v15 = vor.u32 %v559_v9, %v514_v8  ;;  %v516_v16 = vld [vmem:[#allocation7 + $0x38] sm:$0xf0] }
  0x1b   :  { %v172_v5 = vmul.f32 %v849_v62, %v769_v13  ;;  %v860_v19 = vperm.slane %v846_v56, 2  ;;  %v519_v20 = vor.u32 %v558_v11, %v516_v16  ;;  %v506_v23 = vld [vmem:[#allocation7 + $0x20] sm:$0xf]  ;;  %v557_v24 = vld [vmem:[#allocation7 + $0x24] sm:$0xf0]  ;;  %v864_v30 = vperm.slane %v846_v56, 3 }
  0x1c   :  { %182 = vrot.lane.b32.xlu1 %v769_v13, %s702_s0  ;;  %156 = vrot.lane.b32.xlu0 %v769_v13, %s699_s27  ;;  %v556_v25 = vld [vmem:[#allocation7 + $0x24] sm:$0xf]  ;;  %v507_v27 = vor.u32 %v557_v24, %v506_v23  ;;  %v508_v28 = vld [vmem:[#allocation7 + $0x28] sm:$0xf0]  ;;  %v498_v38 = vld [vmem:[#allocation7 + $0x10] sm:$0xf]  ;;  %v170_v8 = vmul.f32 %v849_v62, %v779_v17 }
  0x1d   :  { %569 = vmatpush.bf16.msra.mxu2 %v539_v44  ;;  %423 = vmatpush.bf16.msra.mxu0 %v539_v44  ;;  %v511_v31 = vor.u32 %v556_v25, %v508_v28  ;;  %v555_v39 = vld [vmem:[#allocation7 + $0x14] sm:$0xf0]  ;;  %v554_v40 = vld [vmem:[#allocation7 + $0x14] sm:$0xf]  ;;  %v869_v41 = vperm.slane %v846_v56, 4  ;;  %v883_v61 = vperm.slane %v846_v56, 7 }
  0x1e   :  { %577 = vmatpush.bf16.msra.mxu3 %v543_v47  ;;  %442 = vmatpush.bf16.msra.mxu1 %v543_v47  ;;  %v499_v43 = vor.u32 %v555_v39, %v498_v38  ;;  %v500_v44 = vld [vmem:[#allocation7 + $0x18] sm:$0xf0]  ;;  %v490_v50 = vld [vmem:[#allocation7] sm:$0xf]  ;;  %v553_v51 = vld [vmem:[#allocation7 + $0x4] sm:$0xf0]  ;;  %v171_v38 = vmul.f32 %v849_v62, %v782_v18 }
  0x1f   :  { %178 = vrot.lane.b32.xlu2 %v779_v17, %s702_s0  ;;  %v503_v47 = vor.u32 %v554_v40, %v500_v44  ;;  %v552_v52 = vld [vmem:[#allocation7 + $0x4] sm:$0xf]  ;;  %v492_v57 = vld [vmem:[#allocation7 + $0x8] sm:$0xf0]  ;;  %v215_v59 = vmul.f32 %v869_v41, %v748_v3  ;;  %s705_s16 = smov 16  }
  0x21   :  { %570 = vmatpush.bf16.msra.mxu2 %v531_v53  ;;  %424 = vmatpush.bf16.msra.mxu0 %v531_v53  ;;  %v173_v53 = vmul.f32 %v849_v62, %v760_v10  ;;  %v886_v10 = vperm.slane %v846_v56, 5 }
  0x22   :  { %578 = vmatpush.bf16.msra.mxu3 %v535_v55  ;;  %443 = vmatpush.bf16.msra.mxu1 %v535_v55  ;;  %v491_v55 = vor.u32 %v553_v51, %v490_v50 }
  0x24   :  { %152 = vrot.lane.b32.xlu0 %v779_v17, %s699_s27  ;;  %154 = vrot.lane.b32.xlu1 %v782_v18, %s699_s27  ;;  %v216_v17 = vmul.f32 %v869_v41, %v750_v4 }
  0x25   :  { %571 = vmatpush.bf16.msra.mxu2 %v523_v60  ;;  %425 = vmatpush.bf16.msra.mxu0 %v523_v60  ;;  %v495_v60 = vor.u32 %v552_v52, %v492_v57 }
  0x26   :  { %579 = vmatpush.bf16.msra.mxu3 %v527_v0  ;;  %444 = vmatpush.bf16.msra.mxu1 %v527_v0 }
  0x27   :  { %227 = vrot.lane.b32.xlu2 %v750_v4, %s702_s0  ;;  %v284_v4 = vmul.f32 %v883_v61, %v809_v26 }
  0x29   :  { %572 = vmatpush.bf16.msra.mxu2 %v515_v15  ;;  %426 = vmatpush.bf16.msra.mxu0 %v515_v15 }
  0x2a   :  { %580 = vmatpush.bf16.msra.mxu3 %v519_v20  ;;  %445 = vmatpush.bf16.msra.mxu1 %v519_v20 }
  0x2c   :  { %180 = vrot.lane.b32.xlu0 %v782_v18, %s702_s0  ;;  %225 = vrot.lane.b32.xlu1 %v748_v3, %s702_s0 }
  0x2d   :  { %573 = vmatpush.bf16.msra.mxu2 %v507_v27  ;;  %427 = vmatpush.bf16.msra.mxu0 %v507_v27 }
  0x2e   :  { %581 = vmatpush.bf16.msra.mxu3 %v511_v31  ;;  %446 = vmatpush.bf16.msra.mxu1 %v511_v31 }
  0x2f   :  { %267 = vrot.lane.b32.xlu2 %v799_v22, %s699_s27 }
  0x31   :  { %574 = vmatpush.bf16.msra.mxu2 %v499_v43  ;;  %428 = vmatpush.bf16.msra.mxu0 %v499_v43 }
  0x32   :  { %582 = vmatpush.bf16.msra.mxu3 %v503_v47  ;;  %447 = vmatpush.bf16.msra.mxu1 %v503_v47  ;;  %v281_v47 = vmul.f32 %v883_v61, %v819_v29 }
  0x34   :  { %195 = vrot.lane.b32.xlu0 %v767_v12, %s699_s27  ;;  %197 = vrot.lane.b32.xlu1 %v756_v7, %s699_s27 }
  0x35   :  { %575 = vmatpush.bf16.msra.mxu2 %v491_v55  ;;  %429 = vmatpush.bf16.msra.mxu0 %v491_v55 }
  0x36   :  { %583 = vmatpush.bf16.msra.mxu3 %v495_v60  ;;  %448 = vmatpush.bf16.msra.mxu1 %v495_v60 }
  0x37   :  { %223 = vrot.lane.b32.xlu2 %v756_v7, %s702_s0 }
  0x3c   :  { %269 = vrot.lane.b32.xlu0 %v809_v26, %s699_s27  ;;  %221 = vrot.lane.b32.xlu1 %v767_v12, %s702_s0 }
  0x3f   :  { %263 = vrot.lane.b32.xlu2 %v819_v29, %s699_s27 }
  0x44   :  { %293 = vrot.lane.b32.xlu0 %v799_v22, %s702_s0  ;;  %295 = vrot.lane.b32.xlu1 %v809_v26, %s702_s0 }
  0x47   :  { %291 = vrot.lane.b32.xlu2 %v828_v32, %s702_s0 }
  0x4c   :  { %265 = vrot.lane.b32.xlu0 %v828_v32, %s699_s27  ;;  %289 = vrot.lane.b32.xlu1 %v819_v29, %s702_s0 }
  0x69   :  { %v836_v33 = vpop.permute.xlu2 %199 }
  0x6a   :  { %v206_v45 = vmul.f32 %v864_v30, %v836_v33  ;;  %v880_v33 = vperm.slane %v846_v56, 6  ;;  %v283_v56 = vmul.f32 %v883_v61, %v799_v22 }
  0x71   :  { %v838_v34 = vpop.permute.xlu2 %201 }
  0x72   :  { %v207_v11 = vmul.f32 %v864_v30, %v838_v34 }
  0x79   :  { %v840_v46 = vpop.permute.xlu2 %178 }
  0x81   :  { %v857_v14 = vpop.permute.xlu2 %227 }
  0x82   :  { %v233_v34 = vmul.f32 %v886_v10, %v857_v14 }
  0x86   :  { %v842_v48 = vpop.permute.xlu1 %184  ;;  %v844_v49 = vpop.permute.xlu0 %158 }
  0x87   :  { %v164_v54 = vmul.f32 %v852_v63, %v844_v49  ;;  %v190_v49 = vmul.f32 %v860_v19, %v842_v48 }
  0x89   :  { %v268_v42 = vpop.permute.xlu2 %267  ;;  %v177_v0 = vadd.f32 %v173_v53, %v164_v54 }
  0x8b   :  { %v194_v15 = vadd.f32 %v190_v49, %v177_v0 }
  0x8d   :  { %v211_v24 = vadd.f32 %v207_v11, %v194_v15 }
  0x8e   :  { %v183_v1 = vpop.permute.xlu1 %182  ;;  %v157_v2 = vpop.permute.xlu0 %156 }
  0x8f   :  { %v163_v6 = vmul.f32 %v852_v63, %v157_v2  ;;  %v189_v21 = vmul.f32 %v860_v19, %v183_v1  ;;  %v220_v31 = vadd.f32 %v216_v17, %v211_v24 }
  0x91   :  { %v176_v13 = vadd.f32 %v172_v5, %v163_v6  ;;  %v274_v6 = vmul.f32 %v880_v33, %v268_v42  ;;  %v224_v16 = vpop.permute.xlu2 %223  ;;  %v237_v39 = vadd.f32 %v233_v34, %v220_v31 }
  0x93   :  { %v193_v37 = vadd.f32 %v189_v21, %v176_v13  ;;  %v187_v21 = vmul.f32 %v860_v19, %v840_v46 }
  0x95   :  { %v210_v58 = vadd.f32 %v206_v45, %v193_v37  ;;  %v213_v37 = vmul.f32 %v869_v41, %v767_v12 }
  0x96   :  { %v153_v35 = vpop.permute.xlu0 %152  ;;  %v866_v36 = vpop.permute.xlu1 %154 }
  0x97   :  { %v219_v3 = vadd.f32 %v215_v59, %v210_v58  ;;  %v161_v48 = vmul.f32 %v852_v63, %v153_v35  ;;  %v162_v40 = vmul.f32 %v852_v63, %v866_v36  ;;  %v593_v36 = vld [vmem:[#allocation5 + $0x8] ss:$0 sm:$0xff]  ;;  %v214_v59 = vmul.f32 %v869_v41, %v756_v7 }
  0x99   :  { %v174_v13 = vadd.f32 %v170_v8, %v161_v48  ;;  %v264_v46 = vpop.permute.xlu2 %263  ;;  %v175_v50 = vadd.f32 %v171_v38, %v162_v40 }
  0x9a   :  { %v272_v12 = vmul.f32 %v880_v33, %v264_v46 }
  0x9b   :  { %v191_v28 = vadd.f32 %v187_v21, %v174_v13 }
  0x9e   :  { %v181_v1 = vpop.permute.xlu0 %180  ;;  %v226_v2 = vpop.permute.xlu1 %225 }
  0x9f   :  { %v232_v5 = vmul.f32 %v886_v10, %v226_v2  ;;  %v188_v18 = vmul.f32 %v860_v19, %v181_v1  ;;  %v594_v19 = vld [vmem:[%s938_s2] ss:$0 sm:$0xff]  ;;  %v231_v1 = vmul.f32 %v886_v10, %v224_v16 }
  0xa1   :  { %v236_v9 = vadd.f32 %v232_v5, %v219_v3  ;;  %v192_v53 = vadd.f32 %v188_v18, %v175_v50  ;;  %v292_v8 = vpop.permute.xlu2 %291 }
  0xa3   :  { %v278_v20 = vadd.f32 %v274_v6, %v236_v9 }
  0xa5   :  { %v287_v23 = vadd.f32 %v283_v56, %v278_v20  ;;  %v282_v56 = vmul.f32 %v883_v61, %v828_v32  ;;  %v336_v32 = vld [vmem:[%s940_s4] sm:$0x3]  ;;  %s703_s4 = smov [#allocation8]  }
  0xa6   :  { %v196_v25 = vpop.permute.xlu0 %195  ;;  %v198_v22 = vpop.permute.xlu1 %197  ;;  %v339_v61 = vperm.slane %v336_v32, 1  ;;  %s472_s11 = sshll.u32 %s703_s4, 4  ;;  %s473_s11 = int_to_ptr.vmem [resolvable:$true] %s472_s11 }
  0xa7   :  { %v204_v27 = vmul.f32 %v864_v30, %v196_v25  ;;  %v205_v51 = vmul.f32 %v864_v30, %v198_v22 }
  0xa9   :  { %v208_v35 = vadd.f32 %v204_v27, %v191_v28  ;;  %v209_v58 = vadd.f32 %v205_v51, %v192_v53 }
  0xab   :  { %v217_v14 = vadd.f32 %v213_v37, %v208_v35  ;;  %v218_v30 = vadd.f32 %v214_v59, %v209_v58 }
  0xad   :  { %v235_v48 = vadd.f32 %v231_v1, %v218_v30 }
  0xae   :  { %v270_v42 = vpop.permute.xlu0 %269  ;;  %v222_v43 = vpop.permute.xlu1 %221 }
  0xaf   :  { %v275_v44 = vmul.f32 %v880_v33, %v270_v42  ;;  %v230_v45 = vmul.f32 %v886_v10, %v222_v43  ;;  %v299_v10 = vmul.f32 %v593_v36, %v292_v8 }
  0xb1   :  { %v279_v62 = vadd.f32 %v275_v44, %v237_v39  ;;  %v234_v26 = vadd.f32 %v230_v45, %v217_v14 }
  0xb3   :  { %v276_v63 = vadd.f32 %v272_v12, %v234_v26  ;;  %v288_v52 = vadd.f32 %v284_v4, %v279_v62 }
  0xb5   :  { %v285_v54 = vadd.f32 %v281_v47, %v276_v63 }
  0xb6   :  { %v294_v55 = vpop.permute.xlu0 %293  ;;  %v296_v57 = vpop.permute.xlu1 %295 }
  0xb7   :  { %v300_v60 = vmul.f32 %v593_v36, %v294_v55  ;;  %v301_v29 = vmul.f32 %v593_v36, %v296_v57 }
  0xb9   :  { %v304_v49 = vadd.f32 %v300_v60, %v287_v23  ;;  %v305_v0 = vadd.f32 %v301_v29, %v288_v52 }
  0xbb   :  { %v312_v2 = vadd.f32 %v594_v19, %v304_v49  ;;  %v313_v3 = vadd.f32 %v594_v19, %v305_v0 }
  0xbd   :  { %v316_v5 = vmax.f32 %v312_v2, 0.0  ;;  %v317_v6 = vmax.f32 %v313_v3, 0.0 }
  0xbe   :  { %v266_v7 = vpop.permute.xlu0 %265  ;;  %v290_v41 = vpop.permute.xlu1 %289 }
  0xbf   :  { %v273_v9 = vmul.f32 %v880_v33, %v266_v7  ;;  %v298_v11 = vmul.f32 %v593_v36, %v290_v41  ;;  %v319_v15 = vpack.c.bf16 %v317_v6, %v316_v5  ;;  %v338_v33 = vperm.slane %v336_v32, 0 }
  0xc1   :  { %v277_v20 = vadd.f32 %v273_v9, %v235_v48  ;;  %v302_v21 = vadd.f32 %v298_v11, %v285_v54  ;;  %435 = vmatmul.bf16.vlgmr.msra.gmra.mxu2 %v319_v15  ;;  %454 = vmatmul.bf16.vlgmr.msra.gmra.mxu3 %v319_v15 }
  0xc3   :  { %v286_v16 = vadd.f32 %v282_v56, %v277_v20  ;;  %v310_v23 = vadd.f32 %v594_v19, %v302_v21 }
  0xc5   :  { %v303_v13 = vadd.f32 %v299_v10, %v286_v16  ;;  %v314_v17 = vmax.f32 %v310_v23, 0.0 }
  0xc7   :  { %v311_v24 = vadd.f32 %v594_v19, %v303_v13 }
  0xc9   :  { %v315_v25 = vmax.f32 %v311_v24, 0.0 }
  0xcb   :  { %v318_v22 = vpack.c.bf16 %v315_v25, %v314_v17 }
  0xcd   :  { %430 = vmatmul.bf16.vlgmr.msra.gmra.mxu0 %v318_v22  ;;  %449 = vmatmul.bf16.vlgmr.msra.gmra.mxu1 %v318_v22 }
 0x144   :  { %v436_v27 = vpop.f32.mrf.mxu2  ;;  %v455_v28 = vpop.f32.mrf.mxu3 }
 0x145   :  { %v437_v31 = vadd.f32 %v436_v27, %v338_v33  ;;  %v456_v34 = vadd.f32 %v455_v28, %v339_v61 }
 0x147   :  { %464 = vst [vmem:[#allocation8 + $0x20] sm:$0xff] %v437_v31 }
 0x148   :  { %465 = vst [vmem:[#allocation8 + $0x28] sm:$0xff] %v456_v34 }
 0x14a   :  { %v431_v35 = vpop.f32.mrf.mxu0  ;;  %v450_v37 = vpop.f32.mrf.mxu1 }
 0x14b   :  { %v432_v46 = vadd.f32 %v431_v35, %v338_v33  ;;  %v451_v38 = vadd.f32 %v450_v37, %v339_v61 }
 0x14c   :  { %v438_v4 = vpop.f32.mrf.mxu2  ;;  %v457_v39 = vpop.f32.mrf.mxu3 }
 0x14d   :  { %460 = vst [vmem:[#allocation8] sm:$0xff] %v432_v46  ;;  %v439_v40 = vadd.f32 %v438_v4, %v338_v33  ;;  %v458_v42 = vadd.f32 %v457_v39, %v339_v61 }
 0x14e   :  { %461 = vst [vmem:[#allocation8 + $0x8] sm:$0xff] %v451_v38 }
 0x14f   :  { %466 = vst [vmem:[#allocation8 + $0x30] sm:$0xff] %v439_v40 }
 0x150   :  { %467 = vst [vmem:[#allocation8 + $0x38] sm:$0xff] %v458_v42 }
 0x152   :  { %v433_v43 = vpop.f32.mrf.mxu0  ;;  %v452_v44 = vpop.f32.mrf.mxu1 }
 0x153   :  { %v434_v14 = vadd.f32 %v433_v43, %v338_v33  ;;  %v453_v45 = vadd.f32 %v452_v44, %v339_v61 }
 0x155   :  { %462 = vst [vmem:[#allocation8 + $0x10] sm:$0xff] %v434_v14 }
 0x156   :  { %463 = vst [vmem:[#allocation8 + $0x18] sm:$0xff] %v453_v45 }
 0x157   :  { %480 = dma.vmem_to_hbm [thread:$0]  %s473_s11, 1024, %s475_s14, [#allocation4], %s704_s15, %s704_s15, %s705_s16  }
 0x158   :  { %695 = dma.done.wait [#allocation4], 1024  }
 0x159   :  { %696 = vsyncadd [#allocation4], 4294966272 }
 0x15a   :  { %485 = vsyncpa [#allocation3], 1 }
 0x15b   :  { %486 = vsyncpa [#allocation6], 1 }
 0x15c   :  { %487 = vsyncpa [#allocation4], 1 }

</bundles_post_ra>
